<compile_context>
chip_gen: v5e
topology: v5e:2x2
jax: 0.10.0
libtpu: 0.0.40
codegen_flags: <defaults>
</compile_context>

<pallas_src>
import jax
import jax.numpy as jnp
from jax.experimental import pallas as pl
from jax.experimental.pallas import tpu as pltpu

NEG_THRESHOLD = 0.2           # TrackingNet default (mask uses strict `<`, matching tensor.lt)
BN_EPS = 1e-5
MATMUL_DTYPE = jnp.bfloat16   # dtype of feats / folded conv weights on the MXU path


# ---------------------------------------------------------------------------
# Pallas kernel: w_det head (Conv1d->BN->ReLU x2 -> Conv1d(->1)) + sigmoid + mask
# Operates in NCL layout with all 3 branches merged on the lane axis:
# channels on sublanes, (branch * detections) on lanes.
# ---------------------------------------------------------------------------
def w_det_kernel(feats_ref, w1_ref, b1_ref, w2_ref, b2_ref, w3_ref, b3_ref, out_ref):
    x = feats_ref[...]                       # (C, tn)   bf16
    w1 = w1_ref[...]                         # (C, C)    bf16 (BN folded)
    b1 = b1_ref[...]                         # (C, 1)    f32  (BN + conv bias folded)
    w2 = w2_ref[...]                         # (C2, C)   bf16 (BN folded)
    b2 = b2_ref[...]                         # (C2, 1)   f32
    w3 = w3_ref[...]                         # (C2, 1)   f32  (final conv as a column)
    b3 = b3_ref[...]                         # (1, 1)    f32

    # Conv1d(C, C, 1) with BN folded, then ReLU.  f32 accumulation on the MXU.
    h1 = jnp.maximum(
        jnp.dot(w1, x, preferred_element_type=jnp.float32) + b1, 0.0)       # (C, tn) f32

    # Conv1d(C, C//2, 1) with folded BN, then ReLU.  Cast only the matmul input.
    h2 = jnp.maximum(
        jnp.dot(w2, h1.astype(w2.dtype), preferred_element_type=jnp.float32) + b2,
        0.0)                                                                  # (C2, tn) f32

    # Conv1d(C//2, 1, 1) as VPU multiply + sublane (XLU) reduction; avoids a
    # width-1 MXU matmul.
    logits = jnp.sum(h2 * w3, axis=0, keepdims=True) + b3                     # (1, tn)

    # Exact sigmoid (EUP logistic) so the strict `<` threshold matches the
    # float reference, then the negative-threshold mask: s -= (s < thr).
    s = jax.nn.sigmoid(logits)
    out_ref[...] = s - (s < NEG_THRESHOLD).astype(s.dtype)                    # lane-dense store


def _pick_lane_tile(L, C, itemsize):
    """Largest lane-dense tile that divides the merged lane axis L, leaves >=2
    grid steps (so v7x's second TensorCore gets work on the 'parallel' axis),
    and keeps the double-buffered feats block well inside VMEM on all gens."""
    budget = 8 * 1024 * 1024                  # bytes per feats buffer (x2 double-buffer)
    for cand in (8192, 4096, 2048, 1024, 512, 256, 128):
        if L % cand == 0 and L // cand >= 2 and C * cand * itemsize <= budget:
            return cand
    return L                                  # single full-axis block (always legal)


def w_det_pallas(feats_merged, w1f, b1f, w2f, b2f, w3c, b3):
    """feats_merged: (C, 3*N) — branches concatenated along the detection/lane axis.
    Returns det_scores_flat with shape (1, 3*N)."""
    C, L = feats_merged.shape
    C2 = w2f.shape[0]
    tn = _pick_lane_tile(L, C, feats_merged.dtype.itemsize)
    grid = (L // tn,)

    const = lambda shape: pl.BlockSpec(shape, lambda n: (0, 0))  # grid-invariant blocks

    det_scores_flat = pl.pallas_call(
        w_det_kernel,
        out_shape=jax.ShapeDtypeStruct((1, L), jnp.float32),
        grid_spec=pltpu.PrefetchScalarGridSpec(
            num_scalar_prefetch=0,
            grid=grid,
            in_specs=[
                pl.BlockSpec((C, tn), lambda n: (0, n)),  # feats (all branches, lane-tiled)
                const((C, C)),    # w1 (BN folded, bf16)
                const((C, 1)),    # b1 (BN + conv bias folded, f32)
                const((C2, C)),   # w2 (BN folded, bf16)
                const((C2, 1)),   # b2 (f32)
                const((C2, 1)),   # w3 as a column for VPU mul + sublane reduce (f32)
                const((1, 1)),    # b3 (f32)
            ],
            out_specs=pl.BlockSpec((1, tn), lambda n: (0, n)),
        ),
        compiler_params=pltpu.CompilerParams(
            dimension_semantics=("parallel",)),
    )(feats_merged, w1f, b1f, w2f, b2f, w3c, b3)
    return det_scores_flat


# ---------------------------------------------------------------------------
# Deterministic parameter construction (BN in eval mode, folded into the weights)
# ---------------------------------------------------------------------------
def make_w_det_params(key, C):
    C2 = C // 2
    ks = jax.random.split(key, 6)
    # Conv1d kernels (kernel_size=1) in (out_channels, in_channels) layout.
    w1 = jax.random.normal(ks[0], (C, C), jnp.float32) * 0.05
    cb1 = jax.random.normal(ks[1], (C,), jnp.float32) * 0.01
    w2 = jax.random.normal(ks[2], (C2, C), jnp.float32) * 0.05
    cb2 = jax.random.normal(ks[3], (C2,), jnp.float32) * 0.01
    w3 = jax.random.normal(ks[4], (C2,), jnp.float32) * 0.05
    cb3 = jax.random.normal(ks[5], (1,), jnp.float32) * 0.01

    # BatchNorm1d (eval mode): gamma=1, beta=0, running_mean=0, running_var=1,
    # folded directly into conv weight and bias:  y = (s*W) x + (s*cb + beta - s*mean).
    def fold_bn(w, cb, n_ch):
        gamma = jnp.ones((n_ch,), jnp.float32)
        beta = jnp.zeros((n_ch,), jnp.float32)
        mean = jnp.zeros((n_ch,), jnp.float32)
        var = jnp.ones((n_ch,), jnp.float32)
        s = gamma / jnp.sqrt(var + BN_EPS)
        wf = w * s[:, None]
        bf = (beta - mean * s + cb * s).reshape(n_ch, 1)
        return wf, bf

    w1f, b1f = fold_bn(w1, cb1, C)
    w2f, b2f = fold_bn(w2, cb2, C2)
    # Matmul operands in bf16 (halves feats-side HBM traffic, MXU bf16-native);
    # biases / final column stay f32 so post-matmul elementwise math is all f32.
    w1f = w1f.astype(MATMUL_DTYPE)
    w2f = w2f.astype(MATMUL_DTYPE)
    w3c = w3.reshape(C2, 1)
    b3 = cb3.reshape(1, 1)
    return w1f, b1f, w2f, b2f, w3c, b3


# ---------------------------------------------------------------------------
# Stand-in feature path (plain JAX glue), producing the three (C, N) branches.
# TODO(synk): AppearanceNet/PointNet/FusionModule sources were not provided; this
# deterministic linear stand-in only reproduces the (3, C, N) feats contract.
# ---------------------------------------------------------------------------
def feature_standin(key, image_dets, point_dets, det_lens, C):
    k1, k2 = jax.random.split(key)
    img_ch = image_dets.shape[1]
    w_app = jax.random.normal(k1, (C, img_ch), jnp.float32) * 0.1
    w_pt = jax.random.normal(k2, (C, point_dets.shape[1]), jnp.float32) * 0.1
    img_feat = jnp.mean(image_dets, axis=(2, 3)).T                   # (img_ch, N)
    appear = w_app @ img_feat                                        # (C, N)
    points = w_pt @ point_dets.T                                     # (C, N)
    points = points * (det_lens[None, :].astype(jnp.float32) > 0)
    fused = jnp.tanh(appear + points)                                # (C, N)
    return appear, points, fused


def tracking_net_forward(params_key, image_dets, point_dets, det_lens, C):
    appear, points, fused = feature_standin(
        jax.random.fold_in(params_key, 1), image_dets, point_dets, det_lens, C)
    N = appear.shape[-1]

    feats = jnp.stack([appear, points, fused], axis=0)               # (3, C, N) module contract
    # Kernel layout: branches concatenated along the lane (detection) axis.
    feats_merged = jnp.concatenate([appear, points, fused], axis=-1)  # (C, 3*N)

    w_det_params = make_w_det_params(jax.random.fold_in(params_key, 2), C)
    det_scores_flat = w_det_pallas(feats_merged.astype(MATMUL_DTYPE), *w_det_params)
    det_scores = det_scores_flat.reshape(3, N)                       # (3, N)
    return det_scores[2], feats


if __name__ == "__main__":
    key = jax.random.PRNGKey(0)
    # N=128 keeps the merged lane axis (3*N=384) a multiple of 128; C=32 stands
    # in for point_len.
    N, C, H, W = 128, 32, 16, 16

    k_img, k_pt, k_len, k_par = jax.random.split(key, 4)
    image_dets = jax.random.normal(k_img, (N, 3, H, W), jnp.float32)   # N*3*H*W
    point_dets = jax.random.normal(k_pt, (N, 3), jnp.float32)          # N*3
    det_lens = jax.random.randint(k_len, (N,), 1, 64)                  # N

    scores, feats = tracking_net_forward(k_par, image_dets, point_dets, det_lens, C)
    jax.block_until_ready((scores, feats))

    assert scores.shape == (N,), scores.shape
    assert feats.shape == (3, C, N), feats.shape
    assert bool(jnp.all(jnp.isfinite(scores))), "non-finite det scores"
    print("KERNEL_OK")
</pallas_src>

<mosaic_0001>
module attributes {stable_mosaic.version = 11 : i64} {
  func.func @w_det_kernel(%arg0: i32, %arg1: memref<32x128xbf16, #tpu.memory_space<vmem>>, %arg2: memref<32x32xbf16, #tpu.memory_space<vmem>>, %arg3: memref<32x1xf32, #tpu.memory_space<vmem>>, %arg4: memref<16x32xbf16, #tpu.memory_space<vmem>>, %arg5: memref<16x1xf32, #tpu.memory_space<vmem>>, %arg6: memref<16x1xf32, #tpu.memory_space<vmem>>, %arg7: memref<1x1xf32, #tpu.memory_space<vmem>>, %arg8: memref<1x128xf32, #tpu.memory_space<vmem>>) attributes {dimension_semantics = [#tpu.dimension_semantics<parallel>], iteration_bounds = array<i64: 3>, scalar_prefetch = 0 : i64, scratch_operands = 0 : i64, tpu.core_type = #tpu.core_type<tc>, window_params = [{transform_indices = @transform_0, window_bounds = array<i64: 32, 128>}, {pipeline_mode = #tpu.pipeline_mode<synchronous>, transform_indices = @transform_1, window_bounds = array<i64: 32, 32>}, {pipeline_mode = #tpu.pipeline_mode<synchronous>, transform_indices = @transform_2, window_bounds = array<i64: 32, 1>}, {pipeline_mode = #tpu.pipeline_mode<synchronous>, transform_indices = @transform_3, window_bounds = array<i64: 16, 32>}, {pipeline_mode = #tpu.pipeline_mode<synchronous>, transform_indices = @transform_4, window_bounds = array<i64: 16, 1>}, {pipeline_mode = #tpu.pipeline_mode<synchronous>, transform_indices = @transform_5, window_bounds = array<i64: 16, 1>}, {pipeline_mode = #tpu.pipeline_mode<synchronous>, transform_indices = @transform_6, window_bounds = array<i64: 1, 1>}, {transform_indices = @transform_7, window_bounds = array<i64: 1, 128>}]} {
    %c0 = arith.constant 0 : index
    %c0_0 = arith.constant 0 : index
    %0 = vector.load %arg1[%c0, %c0_0] : memref<32x128xbf16, #tpu.memory_space<vmem>>, vector<32x128xbf16>
    %c0_1 = arith.constant 0 : index
    %c0_2 = arith.constant 0 : index
    %1 = vector.load %arg2[%c0_1, %c0_2] : memref<32x32xbf16, #tpu.memory_space<vmem>>, vector<32x32xbf16>
    %c0_3 = arith.constant 0 : index
    %c0_4 = arith.constant 0 : index
    %2 = vector.load %arg3[%c0_3, %c0_4] : memref<32x1xf32, #tpu.memory_space<vmem>>, vector<32x1xf32>
    %c0_5 = arith.constant 0 : index
    %c0_6 = arith.constant 0 : index
    %3 = vector.load %arg4[%c0_5, %c0_6] : memref<16x32xbf16, #tpu.memory_space<vmem>>, vector<16x32xbf16>
    %c0_7 = arith.constant 0 : index
    %c0_8 = arith.constant 0 : index
    %4 = vector.load %arg5[%c0_7, %c0_8] : memref<16x1xf32, #tpu.memory_space<vmem>>, vector<16x1xf32>
    %c0_9 = arith.constant 0 : index
    %c0_10 = arith.constant 0 : index
    %5 = vector.load %arg6[%c0_9, %c0_10] : memref<16x1xf32, #tpu.memory_space<vmem>>, vector<16x1xf32>
    %c0_11 = arith.constant 0 : index
    %c0_12 = arith.constant 0 : index
    %6 = vector.load %arg7[%c0_11, %c0_12] : memref<1x1xf32, #tpu.memory_space<vmem>>, vector<1x1xf32>
    %cst = arith.constant dense<0.000000e+00> : vector<32x128xf32>
    %7 = tpu.matmul %1, %0, %cst {dimension_numbers = #tpu.dot_dimension_numbers<[1], [0], [0], [1], [0, 0, 1, 1], [], []>} : vector<32x32xbf16>, vector<32x128xbf16>, vector<32x128xf32> -> vector<32x128xf32>
    %8 = vector.broadcast %2 : vector<32x1xf32> to vector<32x128xf32>
    %9 = arith.addf %7, %8 : vector<32x128xf32>
    %cst_13 = arith.constant 0.000000e+00 : f32
    %10 = vector.broadcast %cst_13 : f32 to vector<32x128xf32>
    %11 = arith.maximumf %9, %10 : vector<32x128xf32>
    %12 = arith.truncf %11 : vector<32x128xf32> to vector<32x128xbf16>
    %cst_14 = arith.constant dense<0.000000e+00> : vector<16x128xf32>
    %13 = tpu.matmul %3, %12, %cst_14 {dimension_numbers = #tpu.dot_dimension_numbers<[1], [0], [0], [1], [0, 0, 1, 1], [], []>} : vector<16x32xbf16>, vector<32x128xbf16>, vector<16x128xf32> -> vector<16x128xf32>
    %14 = vector.broadcast %4 : vector<16x1xf32> to vector<16x128xf32>
    %15 = arith.addf %13, %14 : vector<16x128xf32>
    %cst_15 = arith.constant 0.000000e+00 : f32
    %16 = vector.broadcast %cst_15 : f32 to vector<16x128xf32>
    %17 = arith.maximumf %15, %16 : vector<16x128xf32>
    %18 = vector.broadcast %5 : vector<16x1xf32> to vector<16x128xf32>
    %19 = arith.mulf %17, %18 : vector<16x128xf32>
    %cst_16 = arith.constant dense<0.000000e+00> : vector<128xf32>
    %20 = vector.multi_reduction <add>, %19, %cst_16 [0] : vector<16x128xf32> to vector<128xf32>
    %21 = vector.shape_cast %20 : vector<128xf32> to vector<1x128xf32>
    %22 = vector.broadcast %6 : vector<1x1xf32> to vector<1x128xf32>
    %23 = arith.addf %21, %22 : vector<1x128xf32>
    %24 = arith.negf %23 : vector<1x128xf32>
    %25 = math.exp %24 : vector<1x128xf32>
    %cst_17 = arith.constant 1.000000e+00 : f32
    %26 = vector.broadcast %cst_17 : f32 to vector<1x128xf32>
    %27 = arith.addf %26, %25 : vector<1x128xf32>
    %28 = arith.divf %26, %27 : vector<1x128xf32>
    %cst_18 = arith.constant 2.000000e-01 : f32
    %29 = vector.broadcast %cst_18 : f32 to vector<1x128xf32>
    %30 = arith.cmpf olt, %28, %29 : vector<1x128xf32>
    %31 = arith.extui %30 : vector<1x128xi1> to vector<1x128xi32>
    %32 = arith.sitofp %31 : vector<1x128xi32> to vector<1x128xf32>
    %33 = arith.subf %28, %32 : vector<1x128xf32>
    %c0_19 = arith.constant 0 : index
    %c0_20 = arith.constant 0 : index
    %34 = vector.load %arg8[%c0_19, %c0_20] : memref<1x128xf32, #tpu.memory_space<vmem>>, vector<1x128xf32>
    tpu.vector_store %arg8[%c0_19, %c0_20], %33 {strides = array<i32>} : memref<1x128xf32, #tpu.memory_space<vmem>>, vector<1x128xf32>,
    return
  }
  func.func @transform_0(%arg0: i32) -> (i32, i32) {
    %c0_i32 = arith.constant 0 : i32
    %c0_i32_0 = arith.constant 0 : i32
    return %c0_i32, %arg0 : i32, i32
  }
  func.func @transform_1(%arg0: i32) -> (i32, i32) {
    %c0_i32 = arith.constant 0 : i32
    %c0_i32_0 = arith.constant 0 : i32
    %c0_i32_1 = arith.constant 0 : i32
    return %c0_i32, %c0_i32_0 : i32, i32
  }
  func.func @transform_2(%arg0: i32) -> (i32, i32) {
    %c0_i32 = arith.constant 0 : i32
    %c0_i32_0 = arith.constant 0 : i32
    %c0_i32_1 = arith.constant 0 : i32
    return %c0_i32, %c0_i32_0 : i32, i32
  }
  func.func @transform_3(%arg0: i32) -> (i32, i32) {
    %c0_i32 = arith.constant 0 : i32
    %c0_i32_0 = arith.constant 0 : i32
    %c0_i32_1 = arith.constant 0 : i32
    return %c0_i32, %c0_i32_0 : i32, i32
  }
  func.func @transform_4(%arg0: i32) -> (i32, i32) {
    %c0_i32 = arith.constant 0 : i32
    %c0_i32_0 = arith.constant 0 : i32
    %c0_i32_1 = arith.constant 0 : i32
    return %c0_i32, %c0_i32_0 : i32, i32
  }
  func.func @transform_5(%arg0: i32) -> (i32, i32) {
    %c0_i32 = arith.constant 0 : i32
    %c0_i32_0 = arith.constant 0 : i32
    %c0_i32_1 = arith.constant 0 : i32
    return %c0_i32, %c0_i32_0 : i32, i32
  }
  func.func @transform_6(%arg0: i32) -> (i32, i32) {
    %c0_i32 = arith.constant 0 : i32
    %c0_i32_0 = arith.constant 0 : i32
    %c0_i32_1 = arith.constant 0 : i32
    return %c0_i32, %c0_i32_0 : i32, i32
  }
  func.func @transform_7(%arg0: i32) -> (i32, i32) {
    %c0_i32 = arith.constant 0 : i32
    %c0_i32_0 = arith.constant 0 : i32
    return %c0_i32, %arg0 : i32, i32
  }
}

</mosaic_0001>

<bundles_post_ra>
// kernel: tpu_custom_call.1
= control target key start
LH: loop header
LB: loop body
LE: loop exit
PB: predicated region body
PF: predicated region fallthrough
CT: control target
= control target key end

     0   :  { %s1013_s0 = inlined_call_operand.vmem [shape: bf16[32,384], index: 0, kind: input, shape index: {}]   ;;  %s1014_s1 = inlined_call_operand.vmem [shape: bf16[32,32], index: 1, kind: input, shape index: {}]   ;;  %s1015_s2 = inlined_call_operand.vmem [shape: f32[32,1], index: 2, kind: input, shape index: {}]   ;;  %s1016_s3 = inlined_call_operand.hbm [shape: bf16[16,32], index: 3, kind: input, shape index: {}]   ;;  %s1017_s4 = inlined_call_operand.vmem [shape: f32[16,1], index: 4, kind: input, shape index: {}]   ;;  %s1018_s5 = inlined_call_operand.vmem [shape: f32[16,1], index: 5, kind: input, shape index: {}]   ;;  %s1019_s6 = inlined_call_operand.<no memory space> [shape: f32[1,1], index: 6, kind: input, shape index: {}]   ;;  %s1020_s7 = inlined_call_operand.hbm [shape: f32[1,384], index: 7, kind: output, shape index: {}]  }
   0x1   :  { %v12_v0 = vstv %s1019_s6 }
   0x2   :  { %13 = vst [vmem:[#allocation2] sm:$0x1] %v12_v0 }
   0x3   :  { %14 = vsyncpa [#allocation5], 0 }
   0x4   :  { %15 = vsyncpa [#allocation6], 0 }
   0x5   :  { %17 = vsyncpa [#allocation6 + $0x1], 0  ;;  %s864_s26 = smov 0   ;;  %s866_s27 = smov 0  }
   0x6   :  { %s868_s28 = smov 0   ;;  %s870_s29 = smov 0  }
   0x7 LB: > { %s885_s6 = sadd.s32 4294967295, %s814_s29   ;;  %s614_s30 = sadd.s32 4294967294, %s814_s29   ;;  %s814_s29 = sphi %s870_s29, %s1028_s29   ;;  %s810_s28 = sphi %s868_s28, %s1027_s28   ;;  %s806_s27 = sphi %s866_s27, %s1026_s27   ;;  %s802_s26 = sphi %s864_s26, %s1025_s26  }
   0x8   : > { %s889_s8 = sadd.s32 1, %s814_s29   ;;  %s30_s9 = sadd.s32 1, %s810_s28 }
   0x9   : > { %s27_s10 = ssub.s32 %s814_s29, %s889_s8  ;;  %p37_p0 = scmp.ne.s32.totalorder %s810_s28, %s806_s27 }
   0xa   : > { %p28_p1 = scmp.eq.s32.totalorder %s27_s10, 0  ;;  %p38_p2 = scmp.eq.s32.totalorder %s814_s29, 0 }
   0xb   : > { %p193_p3 = scmp.eq.s32.totalorder %s885_s6, 2  ;;  %p198_p4 = scmp.ne.s32.totalorder %s806_s27, %s802_s26 }
   0xc   : > { %s901_s11 = scalar_select %p28_p1, %s810_s28, %s30_s9  }
   0xd   : > { %p903_p5 = por %p38_p2, %p37_p0  ;;  %p907_p6 = por %p193_p3, %p37_p0 }
   0xe   : > { %p199_p7 = scmp.eq.s32.totalorder %s614_s30, 2  ;;  %p615_p8 = scmp.ge.s32.totalorder %s814_s29, 1 }
   0xf   : > { %p206_p9 = scmp.lt.s32.totalorder %s814_s29, 4  ;;  %p671_p11 = scmp.eq.s32.totalorder %s885_s6, 0 }
  0x10   : > { %p913_p10 = por %p199_p7, %p198_p4  ;;  %s223_s18 = sshll.u32 %s1016_s3, 4  ;;  %s224_s18 = int_to_ptr.hbm [resolvable:$true] %s223_s18 }
  0x11   : > { %p918_p12 = pnand %p615_p8, %p206_p9  ;;  %s816_s19 = smov [#allocation4]  }
  0x12   : > { %s225_s20 = sshll.u32 %s816_s19, 4  ;;  %s817_s21 = smov 64   ;;  %s226_s20 = int_to_ptr.vmem [resolvable:$true] %s225_s20 }
  0x13   : > { %p663_p13 = pneg %p918_p12  ;;  %s818_s22 = smov 4  }
  0x14   : > { %p617_p1 = scmp.ge.s32.totalorder %s814_s29, 3 }
  0x15   : > { %p664_p0 = pnand %p671_p11, %p663_p13 }
  0x16   : > { %244 = sbr.rel (%p617_p1) target bundleno = 35 (0x23), region = 40 }
  0x17   : > { %666 = dma.hbm_to_vmem [thread:$0]  (!%p664_p0), %s224_s18, 128, %s226_s20, [#allocation5], %s817_s21, %s817_s21, %s818_s22  }
  0x1b   : > { %247 = sbr.rel (!%p903_p5) target bundleno = 35 (0x23), region = 44  ;;  %s249_s23 = sand.u32 (%p903_p5), 1, %s810_s28  }
  0x1c   : > { %s619_s24 = sshll.u32 (%p903_p5), %s814_s29, 2  ;;  %s618_s25 = sshll.u32 (%p903_p5), %s249_s23, 4 }
  0x1d   : > { %s253_s10 = scalar_lea.vmem (%p903_p5), %s1013_s0, %s619_s24  ;;  %s251_s16 = scalar_lea.vmem (%p903_p5), [#allocation3], %s618_s25 }
  0x1e   : > { %v270_v1 = vld [vmem:[%s253_s10] sm:$0xf] (%p903_p5)  ;;  %v272_v2 = vld [vmem:[%s253_s10 + $0xc] sm:$0xf] (%p903_p5)  ;;  %v274_v3 = vld [vmem:[%s253_s10 + $0x18] sm:$0xf] (%p903_p5) }
  0x1f   : > { %271 = vst [vmem:[%s251_s16] sm:$0xf] (%p903_p5), %v270_v1  ;;  %v276_v4 = vld [vmem:[%s253_s10 + $0x24] sm:$0xf] (%p903_p5) }
  0x20   : > { %273 = vst [vmem:[%s251_s16 + $0x4] sm:$0xf] %v272_v2 }
  0x21   : > { %275 = vst [vmem:[%s251_s16 + $0x8] sm:$0xf] %v274_v3 }
  0x22   : > { %277 = vst [vmem:[%s251_s16 + $0xc] sm:$0xf] %v276_v4 }
  0x23 PF: > { %312 = sbr.rel (%p918_p12) target bundleno = 394 (0x18a), region = 85  ;;  %s940_s12 = sand.u32 (!%p918_p12), 1, %s806_s27  }
  0x24   : > { %s621_s17 = sshll.u32 (!%p918_p12), %s940_s12, 4 }
  0x25   : > { %s317_s18 = scalar_lea.vmem (!%p918_p12), [#allocation3], %s621_s17 }
  0x28   : > { %793 = dma.done.wait (%p671_p11), [#allocation5], 128  }
  0x29   : > { %795 = vsyncadd (%p671_p11), [#allocation5], 4294967168  ;;  %v819_v5 = vmov 0   ;;  %v651_v6 = vld [vmem:[%s317_s18 + $0x8] sm:$0xff]  ;;  %v650_v9 = vld [vmem:[%s317_s18] sm:$0xff]  ;;  %vm412_vm0 = vcmask 261120   ;;  %s537_s30 = scalar_lea.hbm %s1020_s7, %s885_s6 }
  0x2a   : > { %711 = vset.pattern.permute.xlu0 %v819_v5  ;;  %712 = vset.pattern.permute.xlu1 %v819_v5  ;;  %v361_v7 = vld [vmem:[%s1015_s2 + $0x10] sm:$0xff]  ;;  %v359_v8 = vld [vmem:[%s1015_s2] sm:$0xff]  ;;  %v653_v10 = vld [vmem:[%s1014_s1 + $0x8] sm:$0xff]  ;;  %s349_s9 = scalar_lea.vmem [#allocation7], %s940_s12  ;;  %s541_s16 = sshll.u32 %s537_s30, 4  ;;  %s542_s16 = int_to_ptr.hbm [resolvable:$true] %s541_s16 }
  0x2b   : > { %713 = vset.pattern.permute.xlu2 %v819_v5  ;;  %655 = vmatpush.bf16.msra.mxu2 %v651_v6  ;;  %v652_v11 = vld [vmem:[%s1014_s1] sm:$0xff]  ;;  %v362_v12 = vld [vmem:[%s1015_s2 + $0x18] sm:$0xff]  ;;  %v360_v13 = vld [vmem:[%s1015_s2 + $0x8] sm:$0xff]  ;;  %s539_s10 = sshll.u32 %s349_s9, 4  ;;  %s529_s17 = scalar_lea.sflag [#allocation6], %s940_s12  ;;  %s540_s10 = int_to_ptr.vmem [resolvable:$true] %s539_s10 }
  0x2c   : > { %425 = vmatpush.bf16.msra.mxu0 %v651_v6  ;;  %382 = vperm.xlu0 %711, %v361_v7   ;;  %v367_v14 = vld [vmem:[%s1018_s5] sm:$0xff]  ;;  %v368_v15 = vld [vmem:[%s1018_s5 + $0x8] sm:$0xff]  ;;  %s762_s18 = sshra.s32 %s542_s16, 4  ;;  %s768_s20 = scalar_lea.hbm %s1020_s7, 3  ;;  %s763_s18 = int_to_ptr.hbm [resolvable:$true] %s762_s18 }
  0x2d   : > { %372 = vperm.xlu1 %712, %v359_v8   ;;  %v365_v16 = vld [vmem:[%s1017_s4] sm:$0xff]  ;;  %v366_v18 = vld [vmem:[%s1017_s4 + $0x8] sm:$0xff]  ;;  %s764_s6 = scalar_lea.hbm %s763_s18, 1  ;;  %p769_p5 = scmp.lt.s32.totalorder %s763_s18, %s1020_s7 }
  0x2e   : > { %446 = vperm.xlu2 %713, %v365_v16   ;;  %v369_v22 = vld [vmem:[#allocation2] sm:$0x1]  ;;  %v654_v37 = vld [vmem:[#allocation4] sm:$0xff]  ;;  %p765_p2 = scmp.ne.s32.totalorder %s763_s18, %s764_s6  ;;  %p770_p7 = scmp.lt.s32.totalorder %s768_s20, %s764_s6 }
  0x2f   : > { %656 = vmatpush.bf16.msra.mxu2 %v650_v9 }
  0x30   : > { %426 = vmatpush.bf16.msra.mxu0 %v650_v9  ;;  %v820_v9 = vmov 0.0   ;;  %p766_p3 = pnand %p765_p2, %p907_p6  ;;  %p771_p8 = por %p770_p7, %p769_p5 }
  0x32   : > { %640 = vmatmul.msk.bf16.vlgmr.msra.gmra.mxu2 %vm412_vm0, %v653_v10  ;;  %p767_p4 = pneg %p766_p3 }
  0x33   : > { %639 = vmatmul.msk.bf16.vlgmr.msra.gmra.mxu0 %vm412_vm0, %v652_v11 }
  0x34   : > { %387 = vperm.xlu0 %711, %v362_v12   ;;  %p772_p9 = pnand %p771_p8, %p767_p4 }
  0x35   : > { %377 = vperm.xlu1 %712, %v360_v13  }
  0x36   : > { %451 = vperm.xlu2 %713, %v366_v18  }
  0x3c   : > { %480 = vperm.xlu0 %711, %v367_v14  }
  0x3d   : > { %485 = vperm.xlu1 %712, %v368_v15  }
  0x3e   : > { %499 = vperm.xlu2 %713, %v369_v22  }
  0x88   : > { %v447_v38 = vpop.permute.xlu2 %446 }
  0x90   : > { %v452_v41 = vpop.permute.xlu2 %451 }
  0x98   : > { %v500_v55 = vpop.permute.xlu2 %499 }
  0x99   : > { %v502_v57 = vperm.slane %v500_v55, 0 }
  0x9e   : > { %v383_v19 = vpop.permute.xlu0 %382 }
  0x9f   : > { %v373_v20 = vpop.permute.xlu1 %372 }
  0xa6   : > { %v388_v24 = vpop.permute.xlu0 %387 }
  0xa7   : > { %v378_v26 = vpop.permute.xlu1 %377 }
  0xae   : > { %v481_v46 = vpop.permute.xlu0 %480 }
  0xaf   : > { %v486_v47 = vpop.permute.xlu1 %485 }
  0xb0   : > { %v428_v17 = vpop.f32.mrf.mxu0 }
  0xb1   : > { %v429_v28 = vadd.f32 %v428_v17, %v373_v20 }
  0xb3   : > { %v438_v33 = vmax.f32 %v429_v28, 0.0 }
  0xb5   : > { %v433_v21 = vpop.f32.mrf.mxu2 }
  0xb6   : > { %v434_v25 = vadd.f32 %v433_v21, %v383_v19 }
  0xb8   : > { %v430_v23 = vpop.f32.mrf.mxu0  ;;  %v440_v31 = vmax.f32 %v434_v25, 0.0 }
  0xb9   : > { %v431_v29 = vadd.f32 %v430_v23, %v378_v26 }
  0xbb   : > { %v439_v34 = vmax.f32 %v431_v29, 0.0 }
  0xbd   : > { %v435_v27 = vpop.f32.mrf.mxu2  ;;  %v442_v36 = vpack.c.bf16 %v439_v34, %v438_v33 }
  0xbe   : > { %v436_v30 = vadd.f32 %v435_v27, %v388_v24 }
  0xc0   : > { %v441_v32 = vmax.f32 %v436_v30, 0.0 }
  0xc2   : > { %v443_v35 = vpack.c.bf16 %v441_v32, %v440_v31 }
  0xc4   : > { %468 = vmatpush.bf16.msra.mxu1 %v443_v35 }
  0xc8   : > { %469 = vmatpush.bf16.msra.mxu1 %v442_v36 }
  0xcb   : > { %645 = vmatmul.msk.bf16.vlgmr.msra.gmra.mxu1 %vm412_vm0, %v654_v37 }
 0x148   : > { %v471_v39 = vpop.f32.mrf.mxu1 }
 0x149   : > { %v472_v40 = vadd.f32 %v471_v39, %v447_v38 }
 0x14b   : > { %v476_v43 = vmax.f32 %v472_v40, 0.0 }
 0x14d   : > { %v488_v48 = vmul.f32 %v481_v46, %v476_v43 }
 0x150   : > { %v473_v42 = vpop.f32.mrf.mxu1 }
 0x151   : > { %v474_v44 = vadd.f32 %v473_v42, %v452_v41 }
 0x153   : > { %v477_v45 = vmax.f32 %v474_v44, 0.0 }
 0x155   : > { %v489_v49 = vmul.f32 %v486_v47, %v477_v45 }
 0x157   : > { %v490_v50 = vadd.f32 %v489_v49, %v488_v48 }
 0x159   : > { %v491_v51 = vrot.slane %v490_v50, 4 }
 0x15b   : > { %v492_v52 = vadd.f32 %v491_v51, %v490_v50 }
 0x15d   : > { %v493_v53 = vrot.slane %v492_v52, 2 }
 0x15f   : > { %v494_v54 = vadd.f32 %v493_v53, %v492_v52 }
 0x161   : > { %v495_v56 = vrot.slane %v494_v54, 1 }
 0x163   : > { %v496_v58 = vadd.f32 %v495_v56, %v494_v54 }
 0x165   : > { %v503_v59 = vadd.f32 %v502_v57, %v496_v58 }
 0x167   : > { %v646_v60 = vmul.f32 -1.442695, %v503_v59 }
 0x169   : > { %714 = vpow2.f32 %v646_v60 }
 0x16f   : > { %v715_v61 = vpop.eup %714 }
 0x170   : > { %v507_v62 = vadd.f32 1.0, %v715_v61 }
 0x172   : > { %716 = vrcp.f32 %v507_v62  ;;  %v519_v2 = vand.u32 2147483648, %v507_v62  ;;  %v517_v4 = vand.u32 2147483647, %v507_v62  ;;  %vm513_vm2 = vweird.f32 %v507_v62 }
 0x174   : > { %v520_v6 = vor.u32 1.1754944e-38, %v519_v2  ;;  %vm518_vm4 = vcmp.eq.f32.partialorder %v517_v4, 8.507059e+37 }
 0x178   : > { %v717_v63 = vpop.eup %716 }
 0x179   : > { %v509_v0 = vmul.f32 %v717_v63, %v507_v62  ;;  %vm514_vm1 = vweird.f32 %v717_v63 }
 0x17a   : > { %vm515_vm3 = vmor %vm513_vm2, %vm514_vm1 }
 0x17b   : > { %v510_v1 = vsub.f32 1.0, %v509_v0 }
 0x17d   : > { %v511_v3 = vmul.f32 %v717_v63, %v510_v1 }
 0x17f   : > { %v512_v5 = vadd.f32 %v717_v63, %v511_v3 }
 0x181   : > { %v516_v7 = vsel %vm515_vm3, %v717_v63, %v512_v5 }
 0x182   : > { %v521_v8 = vsel %vm518_vm4, %v520_v6, %v516_v7 }
 0x183   : > { %vm523_vm5 = vcmp.lt.f32.partialorder %v521_v8, 0.2 }
 0x184   : > { %v647_v10 = vsel %vm523_vm5, 1.0, %v820_v9 }
 0x185   : > { %v526_v11 = vsub.f32 %v521_v8, %v647_v10 }
 0x187   : > { %527 = vst [vmem:[%s349_s9] sm:$0x1] %v526_v11 }
 0x188   : > { %775 = shalt.err (!%p772_p9)
}
 0x189   : > { %661 = dma.vmem_to_hbm [thread:$0]  (%p907_p6), %s540_s10, 16, %s542_s16, %s529_s17  }
 0x18a PF: > { %p673_p11 = scmp.ge.s32.totalorder %s814_s29, 2  ;;  %s553_s12 = sand.u32 1, %s802_s26  }
 0x18b   : > { %s554_s23 = scalar_lea.sflag [#allocation6], %s553_s12 }
 0x18c   : > { %p668_p12 = pnand %p673_p11, %p913_p10 }
 0x18e   : > { %p669_p13 = pneg %p668_p12 }
 0x190   : > { %797 = dma.done.wait (%p669_p13), %s554_s23, 16  }
 0x191   : > { %799 = vsyncadd (%p669_p13), %s554_s23, 4294967280  ;;  %p20_p0 = scmp.ge.s32.totalorder %s889_s8, 5   ;;  %s1025_s26 = smov %s806_s27 }
 0x192   : > { %s1026_s27 = smov %s810_s28  ;;  %s1027_s28 = smov %s901_s11 }
 0x193   : > { %s1028_s29 = smov %s889_s8  ;;  %22 = sbr.rel (!%p20_p0) target bundleno = 7 (0x7), region = 134 }
 0x198   :  { %559 = vsyncpa [#allocation5], 1 }
 0x199   :  { %561 = vsyncpa [#allocation5 + $0x1], 1 }
 0x19a   :  { %562 = vsyncpa [#allocation6], 1 }
 0x19b   :  { %564 = vsyncpa [#allocation6 + $0x1], 1 }

</bundles_post_ra>
